<compile_context>
chip_gen: v7x
topology: tpu7x:2x2x1
jax: 0.10.0
libtpu: 0.0.40
codegen_flags: <defaults>
</compile_context>

<pallas_src>
import functools

import jax
import jax.numpy as jnp
from jax.experimental import pallas as pl
from jax.experimental.pallas import tpu as pltpu

EPS = 1e-5                       # nn.BatchNorm1d default eps
VMEM_LIMIT = 32 * 1024 * 1024    # explicit scoped-VMEM budget (fits v5e/v6e/v7x)


# --------------------------------------------------------------------------- #
# Kernels
# --------------------------------------------------------------------------- #
def _stats_kernel(x_ref, sum_ref, ssq_ref):
    """Per-channel sum / sum-of-squares over (N, L), accumulated across the grid."""
    @pl.when(pl.program_id(0) == 0)
    def _():
        sum_ref[...] = jnp.zeros_like(sum_ref)
        ssq_ref[...] = jnp.zeros_like(ssq_ref)

    x = x_ref[...]
    sum_ref[...] += jnp.sum(x, axis=(0, 1), keepdims=True)
    ssq_ref[...] += jnp.sum(x * x, axis=(0, 1), keepdims=True)


def _conv1d(h, w_ref, b, pad_s, P):
    """Stride-1 'same' Conv1d on a batch tile.

    h: (Nb, L, C) f32 in registers.  w_ref: (K, Cin, Cout) bf16 ref.
    b: (1, 1, Cout) f32.  pad_s: (Nb, L+2P, C) f32 scratch (only its P edge
    rows are zeroed -- not the whole buffer).  Per-tap MXU matmuls in bf16,
    f32 accumulation.
    """
    Nb, L, C = h.shape
    K, _, Cout = w_ref.shape

    # Zero only the leading/trailing pad rows once, then write the center.
    pad_s[:, pl.ds(0, P), :] = jnp.zeros((Nb, P, C), jnp.float32)
    pad_s[:, pl.ds(P + L, P), :] = jnp.zeros((Nb, P, C), jnp.float32)
    pad_s[:, pl.ds(P, L), :] = h

    acc = jnp.zeros((Nb * L, Cout), jnp.float32)
    for k in range(K):                           # K is small & static -> unrolled
        hk = pad_s[:, pl.ds(k, L), :].reshape(Nb * L, C).astype(jnp.bfloat16)
        acc = acc + jnp.dot(hk, w_ref[k], preferred_element_type=jnp.float32)
    # TODO(synk): for large C, replace the K per-tap dots with a single im2col
    # matmul (lane-concatenated shifted views) to cut MXU pushes / FIFO pops.
    return acc.reshape(Nb, L, Cout) + b


def _stage1_kernel(x_ref, s1_ref, t1_ref, w1_ref, b1_ref,
                   h1_ref, sum_ref, ssq_ref, pad_s):
    """h1 = conv1(relu(bn1(x))); also accumulates bn2 batch statistics of h1."""
    @pl.when(pl.program_id(0) == 0)
    def _():
        sum_ref[...] = jnp.zeros_like(sum_ref)
        ssq_ref[...] = jnp.zeros_like(ssq_ref)

    L = x_ref.shape[1]
    P = (pad_s.shape[1] - L) // 2

    # bn1 (precomputed batch-stat affine: scale/shift) + ReLU; Dropout(0) = id.
    h = jnp.maximum(x_ref[...] * s1_ref[...] + t1_ref[...], 0.0)
    h1 = _conv1d(h, w1_ref, b1_ref[...], pad_s, P)          # f32

    h1_ref[...] = h1.astype(h1_ref.dtype)                   # bf16 out -> half HBM
    # Fused reduction for bn2 statistics (f32, pre-rounding) -> saves an extra
    # full HBM read pass over h1.
    sum_ref[...] += jnp.sum(h1, axis=(0, 1), keepdims=True)
    ssq_ref[...] += jnp.sum(h1 * h1, axis=(0, 1), keepdims=True)


def _stage2_kernel(x_ref, h1_ref, s2_ref, t2_ref, w2_ref, b2_ref,
                   o_ref, pad_s, y_s):
    """out = maxpool(conv2(relu(bn2(h1)))) + maxpool(x)."""
    L = h1_ref.shape[1]
    P = (pad_s.shape[1] - L) // 2
    Lh = o_ref.shape[1]

    # bn2 + ReLU (+ Dropout p=0 identity); BN math in f32.
    h = jnp.maximum(h1_ref[...].astype(jnp.float32) * s2_ref[...] + t2_ref[...], 0.0)
    h2 = _conv1d(h, w2_ref, b2_ref[...], pad_s, P)

    # MaxPool1d(kernel_size=2, stride=2) via stride-2 sublane reads.
    # TODO(synk): fold the pool into registers (reshape (Nb,Lh,2,C) + max) to
    # drop the y_s scratch once Mosaic sublane-split reshape is verified.
    y_s[...] = h2
    pooled = jnp.maximum(y_s[:, pl.ds(0, Lh, stride=2), :],
                         y_s[:, pl.ds(1, Lh, stride=2), :])

    # identity = downsampling(x), assumed MaxPool1d(2, 2) on the block input.
    identity = jnp.maximum(x_ref[:, pl.ds(0, Lh, stride=2), :],
                           x_ref[:, pl.ds(1, Lh, stride=2), :])

    o_ref[...] = pooled + identity


# --------------------------------------------------------------------------- #
# Wrapper
# --------------------------------------------------------------------------- #
def _bn_affine(s, ssq, count, gamma, beta):
    """Fold training-mode batch stats into a per-channel scale/shift (f32)."""
    mean = s / count
    var = jnp.maximum(ssq / count - mean * mean, 0.0)       # biased variance
    g = gamma.reshape(1, 1, -1).astype(jnp.float32)
    b = beta.reshape(1, 1, -1).astype(jnp.float32)
    scale = g * jax.lax.rsqrt(var + EPS)
    shift = b - mean * scale
    return scale, shift


def _pick_b_tile(N, L, C, budget_bytes=4 * 1024 * 1024):
    """Largest divisor of N whose (double-buffered) f32 tile working set fits."""
    def tile_bytes(bt):
        # x + h1 + pad scratch + pool scratch + out, x2 for double-buffering.
        return 4 * bt * C * (2 * L + (L + 2) + L + L // 2) * 2
    bt = 1
    for cand in range(1, N + 1):
        if N % cand == 0 and tile_bytes(cand) <= budget_bytes:
            bt = cand
    return bt


def resnet1d_block(x_ncl, params, *, kernel_size=3, padding=1, b_tile=None):
    """x_ncl: (N, C, L) like PyTorch. Returns (N, C, L // 2)."""
    N, C, L = x_ncl.shape
    Cout, Cin, K = params["conv1_w"].shape
    assert Cin == C and Cout == C and K == kernel_size
    assert L % 2 == 0 and 2 * padding == kernel_size - 1    # 'same' conv, even pool

    P = padding
    Lh = L // 2
    if b_tile is None:
        b_tile = _pick_b_tile(N, L, C)
    assert N % b_tile == 0
    grid = (N // b_tile,)
    nL = float(N * L)
    f32 = jnp.float32

    def ch(p):                        # (C,) -> (1, 1, C) lane-broadcast vector
        return p.reshape(1, 1, -1).astype(f32)

    def wkco(w):                      # PyTorch (Cout, Cin, K) -> (K, Cin, Cout) bf16
        return jnp.transpose(w, (2, 1, 0)).astype(jnp.bfloat16)

    # TODO(synk): the NCL<->NLC transposes are separate XLA passes over HBM;
    # for a real pipeline keep NLC end-to-end or fuse them into the neighbors.
    x_nlc = jnp.transpose(x_ncl, (0, 2, 1)).astype(f32)

    tile_spec = pl.BlockSpec((b_tile, L, C), lambda i: (i, 0, 0))
    vec_spec = pl.BlockSpec((1, 1, C), lambda i: (0, 0, 0))
    w_spec = pl.BlockSpec((K, C, C), lambda i: (0, 0, 0))

    # ---- pass 0: bn1 batch statistics over (N, L)  (grid-resident accumulators)
    sum_x, ssq_x = pl.pallas_call(
        _stats_kernel,
        grid=grid,
        in_specs=[tile_spec],
        out_specs=(vec_spec, vec_spec),
        out_shape=(jax.ShapeDtypeStruct((1, 1, C), f32),
                   jax.ShapeDtypeStruct((1, 1, C), f32)),
        compiler_params=pltpu.CompilerParams(
            dimension_semantics=("arbitrary",), vmem_limit_bytes=VMEM_LIMIT),
        cost_estimate=pl.CostEstimate(
            flops=3 * N * L * C, transcendentals=0,
            bytes_accessed=4 * N * L * C),
    )(x_nlc)
    scale1, shift1 = _bn_affine(sum_x, ssq_x, nL,
                                params["bn1_gamma"], params["bn1_beta"])

    # ---- pass 1: h1 = conv1(relu(bn1(x)))  +  fused bn2-stat accumulation
    h1, sum_h1, ssq_h1 = pl.pallas_call(
        _stage1_kernel,
        grid=grid,
        in_specs=[tile_spec, vec_spec, vec_spec, w_spec, vec_spec],
        out_specs=(tile_spec, vec_spec, vec_spec),
        out_shape=(jax.ShapeDtypeStruct((N, L, C), jnp.bfloat16),
                   jax.ShapeDtypeStruct((1, 1, C), f32),
                   jax.ShapeDtypeStruct((1, 1, C), f32)),
        scratch_shapes=[pltpu.VMEM((b_tile, L + 2 * P, C), f32)],
        compiler_params=pltpu.CompilerParams(
            dimension_semantics=("arbitrary",), vmem_limit_bytes=VMEM_LIMIT),
        cost_estimate=pl.CostEstimate(
            flops=2 * N * L * K * C * C + 8 * N * L * C, transcendentals=0,
            bytes_accessed=4 * N * L * C + 2 * N * L * C),
    )(x_nlc, scale1, shift1, wkco(params["conv1_w"]), ch(params["conv1_b"]))
    scale2, shift2 = _bn_affine(sum_h1, ssq_h1, nL,
                                params["bn2_gamma"], params["bn2_beta"])

    # ---- pass 2: out = maxpool(conv2(relu(bn2(h1)))) + maxpool(x)
    out_nlc = pl.pallas_call(
        _stage2_kernel,
        grid=grid,
        in_specs=[tile_spec, tile_spec, vec_spec, vec_spec, w_spec, vec_spec],
        out_specs=pl.BlockSpec((b_tile, Lh, C), lambda i: (i, 0, 0)),
        out_shape=jax.ShapeDtypeStruct((N, Lh, C), f32),
        scratch_shapes=[pltpu.VMEM((b_tile, L + 2 * P, C), f32),
                        pltpu.VMEM((b_tile, L, C), f32)],
        compiler_params=pltpu.CompilerParams(
            dimension_semantics=("parallel",), vmem_limit_bytes=VMEM_LIMIT),
        cost_estimate=pl.CostEstimate(
            flops=2 * N * L * K * C * C + 8 * N * L * C, transcendentals=0,
            bytes_accessed=4 * N * L * C + 2 * N * L * C + 4 * N * Lh * C),
    )(x_nlc, h1, scale2, shift2, wkco(params["conv2_w"]), ch(params["conv2_b"]))

    return jnp.transpose(out_nlc, (0, 2, 1))                # back to NCL


# --------------------------------------------------------------------------- #
# Reference + self-test
# --------------------------------------------------------------------------- #
def _reference(x, p, padding):
    """Plain-JAX reference mirroring the PyTorch forward (training-mode BN)."""
    def bn_relu(h, g, b):
        m = h.mean(axis=(0, 2), keepdims=True)
        v = ((h - m) ** 2).mean(axis=(0, 2), keepdims=True)
        return jnp.maximum((h - m) / jnp.sqrt(v + EPS) * g[None, :, None]
                           + b[None, :, None], 0.0)

    def conv(h, w, b):
        o = jax.lax.conv_general_dilated(h, w, (1,), [(padding, padding)],
                                         dimension_numbers=("NCH", "OIH", "NCH"))
        return o + b[None, :, None]

    h = bn_relu(x, p["bn1_gamma"], p["bn1_beta"])
    h = conv(h, p["conv1_w"], p["conv1_b"])
    h = bn_relu(h, p["bn2_gamma"], p["bn2_beta"])
    h = conv(h, p["conv2_w"], p["conv2_b"])
    N, C, L = h.shape
    pooled = h.reshape(N, C, L // 2, 2).max(-1)
    Nx, Cx, Lx = x.shape
    ident = x.reshape(Nx, Cx, Lx // 2, 2).max(-1)
    return pooled + ident


if __name__ == "__main__":
    key = jax.random.PRNGKey(0)
    ks = jax.random.split(key, 9)
    N, C, L, K = 2, 4, 16, 3         # in_channels = out_channels = 4, length 16

    x = jax.random.normal(ks[0], (N, C, L), jnp.float32)
    params = {
        "bn1_gamma": 1.0 + 0.1 * jax.random.normal(ks[1], (C,), jnp.float32),
        "bn1_beta":  0.1 * jax.random.normal(ks[2], (C,), jnp.float32),
        "conv1_w":   0.3 * jax.random.normal(ks[3], (C, C, K), jnp.float32),
        "conv1_b":   0.1 * jax.random.normal(ks[4], (C,), jnp.float32),
        "bn2_gamma": 1.0 + 0.1 * jax.random.normal(ks[5], (C,), jnp.float32),
        "bn2_beta":  0.1 * jax.random.normal(ks[6], (C,), jnp.float32),
        "conv2_w":   0.3 * jax.random.normal(ks[7], (C, C, K), jnp.float32),
        "conv2_b":   0.1 * jax.random.normal(ks[8], (C,), jnp.float32),
    }

    # b_tile=1 -> grid of 2 steps: exercises pipelining + cross-step accumulators.
    out = resnet1d_block(x, params, kernel_size=K, padding=1, b_tile=1)
    out = jax.block_until_ready(out)

    ref = _reference(x, params, padding=1)
    assert out.shape == (N, C, L // 2), out.shape
    # bf16 matmuls / bf16 h1 storage -> keep a loose-but-meaningful tolerance.
    assert float(jnp.max(jnp.abs(out - ref))) < 5e-2

    print("KERNEL_OK")
</pallas_src>

<mosaic_0001>
module attributes {stable_mosaic.version = 11 : i64} {
  func.func @_stats_kernel(%arg0: i32, %arg1: memref<1x16x4xf32, #tpu.memory_space<vmem>>, %arg2: memref<1x1x4xf32, #tpu.memory_space<vmem>>, %arg3: memref<1x1x4xf32, #tpu.memory_space<vmem>>) attributes {dimension_semantics = [#tpu.dimension_semantics<arbitrary>], iteration_bounds = array<i64: 2>, scalar_prefetch = 0 : i64, scratch_operands = 0 : i64, tpu.core_type = #tpu.core_type<tc>, window_params = [{transform_indices = @transform_0, window_bounds = array<i64: 1, 16, 4>}, {pipeline_mode = #tpu.pipeline_mode<synchronous>, transform_indices = @transform_1, window_bounds = array<i64: 1, 1, 4>}, {pipeline_mode = #tpu.pipeline_mode<synchronous>, transform_indices = @transform_2, window_bounds = array<i64: 1, 1, 4>}]} {
    %c0_i32 = arith.constant 0 : i32
    %0 = arith.cmpi eq, %arg0, %c0_i32 : i32
    %1 = arith.extui %0 : i1 to i32
    %c0_i32_0 = arith.constant 0 : i32
    %2 = arith.cmpi ne, %1, %c0_i32_0 : i32
    scf.if %2 {
      %cst_16 = arith.constant 0.000000e+00 : f32
      %15 = vector.broadcast %cst_16 : f32 to vector<1x1x4xf32>
      %c0_17 = arith.constant 0 : index
      %c0_18 = arith.constant 0 : index
      %c0_19 = arith.constant 0 : index
      %16 = vector.load %arg2[%c0_17, %c0_18, %c0_19] : memref<1x1x4xf32, #tpu.memory_space<vmem>>, vector<1x1x4xf32>
      tpu.vector_store %arg2[%c0_17, %c0_18, %c0_19], %15 {strides = array<i32>} : memref<1x1x4xf32, #tpu.memory_space<vmem>>, vector<1x1x4xf32>,
      %cst_20 = arith.constant 0.000000e+00 : f32
      %17 = vector.broadcast %cst_20 : f32 to vector<1x1x4xf32>
      %c0_21 = arith.constant 0 : index
      %c0_22 = arith.constant 0 : index
      %c0_23 = arith.constant 0 : index
      %18 = vector.load %arg3[%c0_21, %c0_22, %c0_23] : memref<1x1x4xf32, #tpu.memory_space<vmem>>, vector<1x1x4xf32>
      tpu.vector_store %arg3[%c0_21, %c0_22, %c0_23], %17 {strides = array<i32>} : memref<1x1x4xf32, #tpu.memory_space<vmem>>, vector<1x1x4xf32>,
    } else {
    }
    %c0 = arith.constant 0 : index
    %c0_1 = arith.constant 0 : index
    %c0_2 = arith.constant 0 : index
    %3 = vector.load %arg1[%c0, %c0_1, %c0_2] : memref<1x16x4xf32, #tpu.memory_space<vmem>>, vector<1x16x4xf32>
    %c0_3 = arith.constant 0 : index
    %c0_4 = arith.constant 0 : index
    %c0_5 = arith.constant 0 : index
    %4 = vector.load %arg2[%c0_3, %c0_4, %c0_5] : memref<1x1x4xf32, #tpu.memory_space<vmem>>, vector<1x1x4xf32>
    %cst = arith.constant dense<0.000000e+00> : vector<4xf32>
    %5 = vector.multi_reduction <add>, %3, %cst [0, 1] : vector<1x16x4xf32> to vector<4xf32>
    %6 = vector.shape_cast %5 : vector<4xf32> to vector<1x1x4xf32>
    %7 = arith.addf %4, %6 : vector<1x1x4xf32>
    %c0_6 = arith.constant 0 : index
    %c0_7 = arith.constant 0 : index
    %c0_8 = arith.constant 0 : index
    %8 = vector.load %arg2[%c0_6, %c0_7, %c0_8] : memref<1x1x4xf32, #tpu.memory_space<vmem>>, vector<1x1x4xf32>
    tpu.vector_store %arg2[%c0_6, %c0_7, %c0_8], %7 {strides = array<i32>} : memref<1x1x4xf32, #tpu.memory_space<vmem>>, vector<1x1x4xf32>,
    %c0_9 = arith.constant 0 : index
    %c0_10 = arith.constant 0 : index
    %c0_11 = arith.constant 0 : index
    %9 = vector.load %arg3[%c0_9, %c0_10, %c0_11] : memref<1x1x4xf32, #tpu.memory_space<vmem>>, vector<1x1x4xf32>
    %10 = arith.mulf %3, %3 : vector<1x16x4xf32>
    %cst_12 = arith.constant dense<0.000000e+00> : vector<4xf32>
    %11 = vector.multi_reduction <add>, %10, %cst_12 [0, 1] : vector<1x16x4xf32> to vector<4xf32>
    %12 = vector.shape_cast %11 : vector<4xf32> to vector<1x1x4xf32>
    %13 = arith.addf %9, %12 : vector<1x1x4xf32>
    %c0_13 = arith.constant 0 : index
    %c0_14 = arith.constant 0 : index
    %c0_15 = arith.constant 0 : index
    %14 = vector.load %arg3[%c0_13, %c0_14, %c0_15] : memref<1x1x4xf32, #tpu.memory_space<vmem>>, vector<1x1x4xf32>
    tpu.vector_store %arg3[%c0_13, %c0_14, %c0_15], %13 {strides = array<i32>} : memref<1x1x4xf32, #tpu.memory_space<vmem>>, vector<1x1x4xf32>,
    return
  }
  func.func @transform_0(%arg0: i32) -> (i32, i32, i32) {
    %c0_i32 = arith.constant 0 : i32
    %c0_i32_0 = arith.constant 0 : i32
    %c0_i32_1 = arith.constant 0 : i32
    return %arg0, %c0_i32, %c0_i32_0 : i32, i32, i32
  }
  func.func @transform_1(%arg0: i32) -> (i32, i32, i32) {
    %c0_i32 = arith.constant 0 : i32
    %c0_i32_0 = arith.constant 0 : i32
    %c0_i32_1 = arith.constant 0 : i32
    %c0_i32_2 = arith.constant 0 : i32
    return %c0_i32, %c0_i32_0, %c0_i32_1 : i32, i32, i32
  }
  func.func @transform_2(%arg0: i32) -> (i32, i32, i32) {
    %c0_i32 = arith.constant 0 : i32
    %c0_i32_0 = arith.constant 0 : i32
    %c0_i32_1 = arith.constant 0 : i32
    %c0_i32_2 = arith.constant 0 : i32
    return %c0_i32, %c0_i32_0, %c0_i32_1 : i32, i32, i32
  }
}

</mosaic_0001>

<bundles_post_ra>
// kernel: tpu_custom_call.1
= control target key start
LH: loop header
LB: loop body
LE: loop exit
PB: predicated region body
PF: predicated region fallthrough
CT: control target
= control target key end

     0   :  { %8 = vsyncpa [#allocation3], 0  ;;  %s431_s0 = inlined_call_operand.vmem [shape: f32[2,16,4], index: 0, kind: input, shape index: {}]   ;;  %s432_s1 = inlined_call_operand.hbm [shape: f32[1,1,4], index: 1, kind: output, shape index: {0}]   ;;  %s433_s2 = inlined_call_operand.hbm [shape: f32[1,1,4], index: 2, kind: output, shape index: {1}]  }
   0x1   :  { %9 = vsyncpa [#allocation5], 0  ;;  %s357_s9 = smov 0  }
   0x2 LB: > { %s363_s10 = sadd.s32 4294967295, %s337_s9   ;;  %p237_p0 = scmp.ge.s32.totalorder %s337_s9, 1  ;;  %s337_s9 = sphi %s357_s9, %s15_s9  }
   0x3   : > { %p107_p1 = scmp.lt.s32.totalorder %s337_s9, 3 }
   0x5   : > { %p108_p2 = pnand %p237_p0, %p107_p1 }
   0x6   : > { %p124_p3 = scmp.lt.s32.totalorder (!%p108_p2), %s363_s10, 1  ;;  %p240_p4 = scmp.ne.s32.totalorder (!%p108_p2), %s363_s10, 0 }
   0x7   : > { %111 = sbr.rel (%p108_p2) target bundleno = 78 (0x4e), region = 24 }
   0xe   : > { %s125_s11 = scalar_select %p124_p3, %s363_s10, 1 }
   0xf   : > { %132 = sbr.rel (%p240_p4) target bundleno = 22 (0x16), region = 28  ;;  %vm133_vm0 = vcmask (!%p240_p4), 24576   ;;  %v339_v0 = vmov (!%p240_p4), 0.0  }
  0x10   : > { %s247_s12 = sshll.u32 %s125_s11, 4  ;;  %134 = vst.msk [vmem:[#allocation2] sm:$0x1] (!%p240_p4), %vm133_vm0, %v339_v0  ;;  %135 = vst.msk [vmem:[#allocation4] sm:$0x1] (!%p240_p4), %vm133_vm0, %v339_v0 }
  0x11   : > { %s128_s15 = scalar_lea.vmem %s431_s0, %s247_s12 }
  0x16 PF: > { %v136_v1 = vld [vmem:[%s128_s15] sm:$0xff]  ;;  %v137_v2 = vld [vmem:[%s128_s15 + $0x8] sm:$0xff]  ;;  %vm139_vm1 = vcmask 31744   ;;  %s340_s16 = smov [#allocation2]   ;;  %vm150_vm2 = vcmask 24576   ;;  %p256_p5 = scmp.eq.s32.totalorder %s363_s10, 1 }
  0x17   : > { %v140_v3 = vsel %vm139_vm1, %v136_v1, 0.0  ;;  %v141_v4 = vsel %vm139_vm1, %v137_v2, 0.0  ;;  %v153_v5 = vmul.f32 %v136_v1, %v136_v1  ;;  %v154_v6 = vmul.f32 %v137_v2, %v137_v2  ;;  %v138_v20 = vld [vmem:[#allocation2] sm:$0x1]  ;;  %s173_s17 = sshll.u32 %s340_s16, 4  ;;  %s341_s18 = smov [#allocation4]   ;;  %s174_s17 = int_to_ptr.vmem [resolvable:$true] %s173_s17 }
  0x18   : > { %v142_v7 = vadd.f32 %v141_v4, %v140_v3  ;;  %v152_v23 = vld [vmem:[#allocation4] sm:$0x1]  ;;  %s184_s19 = sshll.u32 %s341_s18, 4  ;;  %s271_s20 = scalar_lea.vmem %s174_s17, 16  ;;  %s375_s19 = int_to_ptr.vmem [resolvable:$true] %s184_s19 }
  0x19   : > { %v155_v8 = vsel %vm139_vm1, %v153_v5, 0.0  ;;  %v156_v9 = vsel %vm139_vm1, %v154_v6, 0.0  ;;  %p272_p6 = scmp.ne.s32.totalorder %s174_s17, %s271_s20  ;;  %s277_s21 = scalar_lea.vmem %s174_s17, 32 }
  0x1a   : > { %v143_v10 = vrot.slane %v142_v7, 4  ;;  %v157_v11 = vadd.f32 %v156_v9, %v155_v8  ;;  %p278_p9 = scmp.lt.s32.totalorder %s174_s17, %s174_s17  ;;  %p279_p10 = scmp.lt.s32.totalorder %s277_s21, %s271_s20 }
  0x1b   : > { %p273_p7 = pnand %p272_p6, %p256_p5 }
  0x1c   : > { %v144_v12 = vadd.f32 %v143_v10, %v142_v7  ;;  %v158_v13 = vrot.slane %v157_v11, 4  ;;  %p280_p11 = por %p279_p10, %p278_p9 }
  0x1d   : > { %p274_p8 = pneg %p273_p7 }
  0x1e   : > { %v145_v14 = vrot.slane %v144_v12, 2  ;;  %v159_v15 = vadd.f32 %v158_v13, %v157_v11 }
  0x1f   : > { %p281_p12 = pnand %p280_p11, %p274_p8 }
  0x20   : > { %v146_v16 = vadd.f32 %v145_v14, %v144_v12  ;;  %v160_v17 = vrot.slane %v159_v15, 2 }
  0x22   : > { %v147_v18 = vrot.slane %v146_v16, 1  ;;  %v161_v19 = vadd.f32 %v160_v17, %v159_v15 }
  0x24   : > { %v148_v21 = vadd.f32 %v147_v18, %v146_v16  ;;  %v162_v22 = vrot.slane %v161_v19, 1 }
  0x26   : > { %v149_v24 = vadd.f32 %v148_v21, %v138_v20  ;;  %v163_v25 = vadd.f32 %v162_v22, %v161_v19 }
  0x28   : > { %151 = vst.msk [vmem:[#allocation2] sm:$0x1] %vm150_vm2, %v149_v24  ;;  %v164_v26 = vadd.f32 %v163_v25, %v152_v23 }
  0x29   : > { %284 = shalt.err (!%p281_p12)
}
  0x2a   : > { %s285_s24 = scalar_lea.hbm %s432_s1, 16 }
  0x2b   : > { %p286_p13 = scmp.ne.s32.totalorder %s432_s1, %s285_s24  ;;  %p291_p2 = scmp.lt.u32.totalorder %s285_s24, %s432_s1 }
  0x2d   : > { %p287_p0 = pnand %p286_p13, %p256_p5 }
  0x2f   : > { %p288_p1 = pneg %p287_p0 }
  0x31   : > { %p293_p3 = pnand %p291_p2, %p288_p1 }
  0x33   : > { %296 = shalt.err (!%p293_p3)
}
  0x34   : > { %249 = dma.vmem_to_hbm [thread:$0]  (%p256_p5), %s174_s17, 16, %s432_s1, [#allocation3]   ;;  %165 = vst.msk [vmem:[#allocation4] sm:$0x1] %vm150_vm2, %v164_v26 }
  0x35   : > { %s297_s3 = scalar_lea.vmem %s375_s19, 16  ;;  %s303_s4 = scalar_lea.vmem %s375_s19, 32 }
  0x36   : > { %p298_p4 = scmp.ne.s32.totalorder %s375_s19, %s297_s3  ;;  %p304_p8 = scmp.lt.s32.totalorder %s375_s19, %s375_s19 }
  0x37   : > { %p305_p9 = scmp.lt.s32.totalorder %s303_s4, %s297_s3 }
  0x38   : > { %p299_p6 = pnand %p298_p4, %p256_p5 }
  0x39   : > { %p306_p10 = por %p305_p9, %p304_p8 }
  0x3a   : > { %p300_p7 = pneg %p299_p6 }
  0x3c   : > { %p307_p11 = pnand %p306_p10, %p300_p7 }
  0x3e   : > { %310 = shalt.err (!%p307_p11)
}
  0x3f   : > { %s311_s7 = scalar_lea.hbm %s433_s2, 16 }
  0x40   : > { %p312_p12 = scmp.ne.s32.totalorder %s433_s2, %s311_s7  ;;  %p317_p1 = scmp.lt.u32.totalorder %s311_s7, %s433_s2 }
  0x42   : > { %p313_p13 = pnand %p312_p12, %p256_p5 }
  0x44   : > { %p314_p0 = pneg %p313_p13 }
  0x46   : > { %p319_p2 = pnand %p317_p1, %p314_p0 }
  0x48   : > { %322 = shalt.err (!%p319_p2)
}
  0x49   : > { %251 = dma.vmem_to_hbm [thread:$0]  (%p256_p5), %s375_s19, 16, %s433_s2, [#allocation5]  }
  0x4a   : > { %328 = dma.done.wait (%p256_p5), [#allocation3], 16  }
  0x4b   : > { %330 = vsyncadd (%p256_p5), [#allocation3], 4294967280 }
  0x4c   : > { %332 = dma.done.wait (%p256_p5), [#allocation5], 16  }
  0x4d   : > { %334 = vsyncadd (%p256_p5), [#allocation5], 4294967280 }
  0x4e PF: > { %s15_s9 = sadd.s32 1, %s337_s9  }
  0x4f   : > { %p12_p3 = scmp.ge.s32.totalorder %s15_s9, 4  }
  0x51   :  { %14 = sbr.rel (!%p12_p3) target bundleno = 2 (0x2), region = 63 }
  0x58   :  { %201 = vsyncpa [#allocation3], 1 }
  0x59   :  { %203 = vsyncpa [#allocation3 + $0x1], 1 }
  0x5a   :  { %204 = vsyncpa [#allocation5], 1 }

</bundles_post_ra>
